<compile_context>
chip_gen: v7x
topology: tpu7x:2x2x1
jax: 0.10.0
libtpu: 0.0.40
codegen_flags: <defaults>
</compile_context>

<pallas_src>
import jax
import jax.numpy as jnp
from jax.experimental import pallas as pl
from jax.experimental.pallas import tpu as pltpu


D_OUT_PAD = 128  # lane-dense padded width of the W3 operand (real D_out = 3)


def mlp_kernel(x_ref, w1_ref, b1_ref, w2_ref, b2_ref, w3_ref, b3_ref, o_ref):
    # Fused MLP on one (tm, D_in) row tile. Accumulate in f32 on the MXU.
    x = x_ref[...]
    h1 = jnp.dot(x, w1_ref[...], preferred_element_type=jnp.float32) + b1_ref[...]
    # Cast back to the weight dtype so bf16 weights keep the MXU at its native
    # bf16 rate; no-op in pure-f32 mode.
    h1 = jnp.maximum(h1, 0.0).astype(w2_ref.dtype)
    h2 = jnp.dot(h1, w2_ref[...], preferred_element_type=jnp.float32) + b2_ref[...]
    h2 = jnp.maximum(h2, 0.0).astype(w3_ref.dtype)
    out = jnp.dot(h2, w3_ref[...], preferred_element_type=jnp.float32) + b3_ref[...]
    # Store only the real output columns (o_ref block is (tm, D_out)):
    # writeback is 12 B/row instead of 512 B/row for the padded variant.
    d_out = o_ref.shape[-1]
    o_ref[...] = out[:, :d_out].astype(o_ref.dtype)


def _round_up(n, m):
    return ((n + m - 1) // m) * m


def _infer_num_cores():
    # Best-effort TensorCore count of the local device (2 on megacore parts).
    try:
        return max(1, int(getattr(jax.devices()[0], "num_cores", 1) or 1))
    except Exception:
        return 1


def _choose_tile(n_rows, tm_max, num_cores):
    """Pick (row_tile, padded_rows, grid_steps).

    grid_steps is always a multiple of num_cores (even work split for
    megacore), tiles are 128-row multiples (clean f32/bf16 layouts), and the
    tile never exceeds tm_max.
    """
    tm_max = max(128, _round_up(tm_max, 128))
    num_cores = max(1, num_cores)
    steps = num_cores
    while _round_up(pl.cdiv(n_rows, steps), 128) > tm_max:
        steps += num_cores
    tile = max(128, _round_up(pl.cdiv(n_rows, steps), 128))
    return tile, tile * steps, steps


def reconstructor_forward(x, params, *, tm=2048, compute_dtype=None, num_cores=None):
    """x: (N, input_dim) float32. Returns (N, 3) float32.

    tm: max row-tile size (2048 default; VMEM fits comfortably on v5e/v6e/v7x).
    compute_dtype: optionally jnp.bfloat16 to cast x and weights at the
        boundary (f32 accumulation is preserved inside the kernel).
    num_cores: TensorCores per device (auto-detected if None); used only to
        balance the grid on megacore parts.
    """
    w1, b1, w2, b2, w3, b3 = params
    N, D_in = x.shape
    H = w1.shape[1]          # 128
    D_out = w3.shape[1]      # 3

    if compute_dtype is not None:
        x = x.astype(compute_dtype)
        w1 = w1.astype(compute_dtype)
        w2 = w2.astype(compute_dtype)
        w3 = w3.astype(compute_dtype)

    # Lane-dense MXU operand: pad W3 / b3 to 128 output columns (extra cols 0).
    # Only the first D_out result columns are stored by the kernel.
    w3p = jnp.zeros((H, D_OUT_PAD), w3.dtype).at[:, :D_out].set(w3)
    b3p = jnp.zeros((1, D_OUT_PAD), b3.dtype).at[:, :D_out].set(b3)

    if num_cores is None:
        num_cores = _infer_num_cores()
    tile, n_pad, steps = _choose_tile(N, tm, num_cores)
    if n_pad != N:
        x = jnp.pad(x, ((0, n_pad - N), (0, 0)))

    # Weight/bias BlockSpecs use a constant (0, 0) index_map: the full weight
    # tensors stay resident in VMEM across all grid steps (no re-DMA). Do not
    # "fix" these index_maps to depend on the grid index.
    out = pl.pallas_call(
        mlp_kernel,
        out_shape=jax.ShapeDtypeStruct((n_pad, D_out), jnp.float32),
        grid_spec=pltpu.PrefetchScalarGridSpec(
            num_scalar_prefetch=0,
            grid=(steps,),
            in_specs=[
                pl.BlockSpec((tile, D_in), lambda i: (i, 0)),       # x tile
                pl.BlockSpec((D_in, H), lambda i: (0, 0)),          # W1 (resident)
                pl.BlockSpec((1, H), lambda i: (0, 0)),             # b1
                pl.BlockSpec((H, H), lambda i: (0, 0)),             # W2 (resident)
                pl.BlockSpec((1, H), lambda i: (0, 0)),             # b2
                pl.BlockSpec((H, D_OUT_PAD), lambda i: (0, 0)),     # W3 padded (resident)
                pl.BlockSpec((1, D_OUT_PAD), lambda i: (0, 0)),     # b3 padded
            ],
            # Narrow (tm, D_out) output block: block last dim == full array
            # last dim, so this is legal despite D_out < 128.
            out_specs=pl.BlockSpec((tile, D_out), lambda i: (i, 0)),
        ),
        compiler_params=pltpu.CompilerParams(
            dimension_semantics=("parallel",)),
    )(x, w1, b1, w2, b2, w3p, b3p)

    # Strip row padding only (no column slice needed anymore).
    return out if n_pad == N else out[:N]


def init_params(key, input_dim=40, hidden=128, out_dim=3):
    """Deterministic init matching nn.Linear default U(-1/sqrt(fan_in), +1/sqrt(fan_in))."""
    keys = jax.random.split(key, 6)

    def linear_init(kw, kb, fan_in, fan_out):
        bound = 1.0 / jnp.sqrt(fan_in)
        w = jax.random.uniform(kw, (fan_in, fan_out), jnp.float32, -bound, bound)
        b = jax.random.uniform(kb, (1, fan_out), jnp.float32, -bound, bound)
        return w, b

    w1, b1 = linear_init(keys[0], keys[1], input_dim, hidden)
    w2, b2 = linear_init(keys[2], keys[3], hidden, hidden)
    w3, b3 = linear_init(keys[4], keys[5], hidden, out_dim)
    return (w1, b1, w2, b2, w3, b3)


def _ref_forward(x, params):
    w1, b1, w2, b2, w3, b3 = params
    h = jnp.maximum(x @ w1 + b1, 0.0)
    h = jnp.maximum(h @ w2 + b2, 0.0)
    return h @ w3 + b3


if __name__ == "__main__":
    key = jax.random.PRNGKey(0)
    k_params, k_x = jax.random.split(key)

    input_dim = 40   # pos_encoder='sin_cos'
    N = 256          # number of (encoded) coordinate points
    params = init_params(k_params, input_dim=input_dim)
    x = jax.random.normal(k_x, (N, input_dim), jnp.float32)

    # f32 path (bit-comparable to the reference).
    out = jax.block_until_ready(reconstructor_forward(x, params))
    ref = _ref_forward(x, params)
    assert out.shape == (N, 3)
    assert jnp.allclose(out, ref, atol=1e-5, rtol=1e-5)

    # Non-multiple N (row padding path).
    x_odd = jax.random.normal(k_x, (200, input_dim), jnp.float32)
    out_odd = jax.block_until_ready(reconstructor_forward(x_odd, params))
    ref_odd = _ref_forward(x_odd, params)
    assert out_odd.shape == (200, 3)
    assert jnp.allclose(out_odd, ref_odd, atol=1e-5, rtol=1e-5)

    # bf16 compute path (f32 accumulation inside the kernel) — looser tolerance.
    out_bf16 = jax.block_until_ready(
        reconstructor_forward(x, params, compute_dtype=jnp.bfloat16))
    assert out_bf16.shape == (N, 3)
    assert jnp.allclose(out_bf16, ref, atol=1e-1, rtol=5e-2)

    print("KERNEL_OK")
</pallas_src>

<mosaic_0001>
module attributes {stable_mosaic.version = 11 : i64} {
  func.func @mlp_kernel(%arg0: i32, %arg1: memref<256x40xf32, #tpu.memory_space<vmem>>, %arg2: memref<40x128xf32, #tpu.memory_space<vmem>>, %arg3: memref<1x128xf32, #tpu.memory_space<vmem>>, %arg4: memref<128x128xf32, #tpu.memory_space<vmem>>, %arg5: memref<1x128xf32, #tpu.memory_space<vmem>>, %arg6: memref<128x128xf32, #tpu.memory_space<vmem>>, %arg7: memref<1x128xf32, #tpu.memory_space<vmem>>, %arg8: memref<256x3xf32, #tpu.memory_space<vmem>>) attributes {dimension_semantics = [#tpu.dimension_semantics<parallel>], iteration_bounds = array<i64: 1>, scalar_prefetch = 0 : i64, scratch_operands = 0 : i64, tpu.core_type = #tpu.core_type<tc>, window_params = [{transform_indices = @transform_0, window_bounds = array<i64: 256, 40>}, {pipeline_mode = #tpu.pipeline_mode<synchronous>, transform_indices = @transform_1, window_bounds = array<i64: 40, 128>}, {pipeline_mode = #tpu.pipeline_mode<synchronous>, transform_indices = @transform_2, window_bounds = array<i64: 1, 128>}, {pipeline_mode = #tpu.pipeline_mode<synchronous>, transform_indices = @transform_3, window_bounds = array<i64: 128, 128>}, {pipeline_mode = #tpu.pipeline_mode<synchronous>, transform_indices = @transform_4, window_bounds = array<i64: 1, 128>}, {pipeline_mode = #tpu.pipeline_mode<synchronous>, transform_indices = @transform_5, window_bounds = array<i64: 128, 128>}, {pipeline_mode = #tpu.pipeline_mode<synchronous>, transform_indices = @transform_6, window_bounds = array<i64: 1, 128>}, {transform_indices = @transform_7, window_bounds = array<i64: 256, 3>}]} {
    %c0 = arith.constant 0 : index
    %c0_0 = arith.constant 0 : index
    %0 = vector.load %arg1[%c0, %c0_0] : memref<256x40xf32, #tpu.memory_space<vmem>>, vector<256x40xf32>
    %c0_1 = arith.constant 0 : index
    %c0_2 = arith.constant 0 : index
    %1 = vector.load %arg2[%c0_1, %c0_2] : memref<40x128xf32, #tpu.memory_space<vmem>>, vector<40x128xf32>
    %cst = arith.constant dense<0.000000e+00> : vector<256x128xf32>
    %2 = tpu.matmul %0, %1, %cst {dimension_numbers = #tpu.dot_dimension_numbers<[1], [0], [0], [1], [0, 0, 1, 1], [], []>} : vector<256x40xf32>, vector<40x128xf32>, vector<256x128xf32> -> vector<256x128xf32>
    %c0_3 = arith.constant 0 : index
    %c0_4 = arith.constant 0 : index
    %3 = vector.load %arg3[%c0_3, %c0_4] : memref<1x128xf32, #tpu.memory_space<vmem>>, vector<1x128xf32>
    %4 = vector.broadcast %3 : vector<1x128xf32> to vector<256x128xf32>
    %5 = arith.addf %2, %4 : vector<256x128xf32>
    %cst_5 = arith.constant 0.000000e+00 : f32
    %6 = vector.broadcast %cst_5 : f32 to vector<256x128xf32>
    %7 = arith.maximumf %5, %6 : vector<256x128xf32>
    %c0_6 = arith.constant 0 : index
    %c0_7 = arith.constant 0 : index
    %8 = vector.load %arg4[%c0_6, %c0_7] : memref<128x128xf32, #tpu.memory_space<vmem>>, vector<128x128xf32>
    %cst_8 = arith.constant dense<0.000000e+00> : vector<256x128xf32>
    %9 = tpu.matmul %7, %8, %cst_8 {dimension_numbers = #tpu.dot_dimension_numbers<[1], [0], [0], [1], [0, 0, 1, 1], [], []>} : vector<256x128xf32>, vector<128x128xf32>, vector<256x128xf32> -> vector<256x128xf32>
    %c0_9 = arith.constant 0 : index
    %c0_10 = arith.constant 0 : index
    %10 = vector.load %arg5[%c0_9, %c0_10] : memref<1x128xf32, #tpu.memory_space<vmem>>, vector<1x128xf32>
    %11 = vector.broadcast %10 : vector<1x128xf32> to vector<256x128xf32>
    %12 = arith.addf %9, %11 : vector<256x128xf32>
    %cst_11 = arith.constant 0.000000e+00 : f32
    %13 = vector.broadcast %cst_11 : f32 to vector<256x128xf32>
    %14 = arith.maximumf %12, %13 : vector<256x128xf32>
    %c0_12 = arith.constant 0 : index
    %c0_13 = arith.constant 0 : index
    %15 = vector.load %arg6[%c0_12, %c0_13] : memref<128x128xf32, #tpu.memory_space<vmem>>, vector<128x128xf32>
    %cst_14 = arith.constant dense<0.000000e+00> : vector<256x128xf32>
    %16 = tpu.matmul %14, %15, %cst_14 {dimension_numbers = #tpu.dot_dimension_numbers<[1], [0], [0], [1], [0, 0, 1, 1], [], []>} : vector<256x128xf32>, vector<128x128xf32>, vector<256x128xf32> -> vector<256x128xf32>
    %c0_15 = arith.constant 0 : index
    %c0_16 = arith.constant 0 : index
    %17 = vector.load %arg7[%c0_15, %c0_16] : memref<1x128xf32, #tpu.memory_space<vmem>>, vector<1x128xf32>
    %18 = vector.broadcast %17 : vector<1x128xf32> to vector<256x128xf32>
    %19 = arith.addf %16, %18 : vector<256x128xf32>
    %20 = vector.extract_strided_slice %19 {offsets = [0, 0], sizes = [256, 3], strides = [1, 1]} : vector<256x128xf32> to vector<256x3xf32>
    %c0_17 = arith.constant 0 : index
    %c0_18 = arith.constant 0 : index
    %21 = vector.load %arg8[%c0_17, %c0_18] : memref<256x3xf32, #tpu.memory_space<vmem>>, vector<256x3xf32>
    tpu.vector_store %arg8[%c0_17, %c0_18], %20 {strides = array<i32>} : memref<256x3xf32, #tpu.memory_space<vmem>>, vector<256x3xf32>,
    return
  }
  func.func @transform_0(%arg0: i32) -> (i32, i32) {
    %c0_i32 = arith.constant 0 : i32
    %c0_i32_0 = arith.constant 0 : i32
    return %arg0, %c0_i32 : i32, i32
  }
  func.func @transform_1(%arg0: i32) -> (i32, i32) {
    %c0_i32 = arith.constant 0 : i32
    %c0_i32_0 = arith.constant 0 : i32
    %c0_i32_1 = arith.constant 0 : i32
    return %c0_i32, %c0_i32_0 : i32, i32
  }
  func.func @transform_2(%arg0: i32) -> (i32, i32) {
    %c0_i32 = arith.constant 0 : i32
    %c0_i32_0 = arith.constant 0 : i32
    %c0_i32_1 = arith.constant 0 : i32
    return %c0_i32, %c0_i32_0 : i32, i32
  }
  func.func @transform_3(%arg0: i32) -> (i32, i32) {
    %c0_i32 = arith.constant 0 : i32
    %c0_i32_0 = arith.constant 0 : i32
    %c0_i32_1 = arith.constant 0 : i32
    return %c0_i32, %c0_i32_0 : i32, i32
  }
  func.func @transform_4(%arg0: i32) -> (i32, i32) {
    %c0_i32 = arith.constant 0 : i32
    %c0_i32_0 = arith.constant 0 : i32
    %c0_i32_1 = arith.constant 0 : i32
    return %c0_i32, %c0_i32_0 : i32, i32
  }
  func.func @transform_5(%arg0: i32) -> (i32, i32) {
    %c0_i32 = arith.constant 0 : i32
    %c0_i32_0 = arith.constant 0 : i32
    %c0_i32_1 = arith.constant 0 : i32
    return %c0_i32, %c0_i32_0 : i32, i32
  }
  func.func @transform_6(%arg0: i32) -> (i32, i32) {
    %c0_i32 = arith.constant 0 : i32
    %c0_i32_0 = arith.constant 0 : i32
    %c0_i32_1 = arith.constant 0 : i32
    return %c0_i32, %c0_i32_0 : i32, i32
  }
  func.func @transform_7(%arg0: i32) -> (i32, i32) {
    %c0_i32 = arith.constant 0 : i32
    %c0_i32_0 = arith.constant 0 : i32
    return %arg0, %c0_i32 : i32, i32
  }
}

</mosaic_0001>

<bundles_post_ra>
// kernel: tpu_custom_call.1
= control target key start
LH: loop header
LB: loop body
LE: loop exit
PB: predicated region body
PF: predicated region fallthrough
CT: control target
= control target key end

     0   :  { %vm70_vm0 = vcmask 326656   ;;  %vm952_vm1 = vcmask 23552   ;;  %s1998_s1 = inlined_call_operand.vmem [shape: f32[40,128], index: 1, kind: input, shape index: {}]   ;;  %s1999_s0 = inlined_call_operand.vmem [shape: f32[256,40], index: 0, kind: input, shape index: {}]   ;;  %s2000_s3 = inlined_call_operand.vmem [shape: f32[128,128], index: 3, kind: input, shape index: {}]   ;;  %s2001_s5 = inlined_call_operand.vmem [shape: f32[128,128], index: 5, kind: input, shape index: {}]   ;;  %s2002_s2 = inlined_call_operand.vmem [shape: f32[1,128], index: 2, kind: input, shape index: {}]   ;;  %s2003_s4 = inlined_call_operand.vmem [shape: f32[1,128], index: 4, kind: input, shape index: {}]   ;;  %s2004_s6 = inlined_call_operand.vmem [shape: f32[1,128], index: 6, kind: input, shape index: {}]   ;;  %s2005_s7 = inlined_call_operand.vmem [shape: f32[256,3], index: 7, kind: output, shape index: {}]  }
   0x1   :  { %v58_v0 = vld [vmem:[%s1998_s1] sm:$0xff]  ;;  %v59_v1 = vld [vmem:[%s1998_s1 + $0x8] sm:$0xff]  ;;  %v60_v2 = vld [vmem:[%s1998_s1 + $0x10] sm:$0xff] }
   0x2   :  { %v1375_v3 = vpack.c.bf16 %v59_v1, %v58_v0  ;;  %v61_v4 = vld [vmem:[%s1998_s1 + $0x18] sm:$0xff]  ;;  %v26_v5 = vld [vmem:[%s1999_s0] sm:$0xff]  ;;  %v27_v9 = vld [vmem:[%s1999_s0 + $0x8] sm:$0xff] }
   0x3   :  { %v1379_v6 = vpack.c.bf16 %v61_v4, %v60_v2  ;;  %1167 = vmatprep.mubr.msk.f32.mxu0 %vm70_vm0, %v26_v5  ;;  %v62_v7 = vld [vmem:[%s1998_s1 + $0x20] sm:$0xff]  ;;  %v43_v10 = vld [vmem:[%s1999_s0 + $0x88] sm:$0xff]  ;;  %v28_v11 = vld [vmem:[%s1999_s0 + $0x10] sm:$0xff] }
   0x4   :  { %1376 = vmatprep.subr.bf16.mxu0 %v1375_v3  ;;  %1447 = vmatprep.subr.bf16.mxu1 %v1375_v3  ;;  %v42_v8 = vld [vmem:[%s1999_s0 + $0x80] sm:$0xff]  ;;  %v44_v12 = vld [vmem:[%s1999_s0 + $0x90] sm:$0xff]  ;;  %v425_v14 = vld [vmem:[%s2000_s3 + $0x8] sm:$0xff] }
   0x5   :  { %1378 = vmatpush3.bf16.msra.mxu0 %v1375_v3  ;;  %1450 = vmatpush3.bf16.msra.mxu1 %v1375_v3  ;;  %v424_v13 = vld [vmem:[%s2000_s3] sm:$0xff]  ;;  %v426_v16 = vld [vmem:[%s2000_s3 + $0x10] sm:$0xff]  ;;  %v427_v17 = vld [vmem:[%s2000_s3 + $0x18] sm:$0xff] }
   0x6   :  { %1380 = vmatprep.subr.bf16.mxu0 %v1379_v6  ;;  %1448 = vmatprep.subr.bf16.mxu1 %v1379_v6  ;;  %v1383_v15 = vpack.c.bf16 %v425_v14, %v424_v13  ;;  %v29_v18 = vld [vmem:[%s1999_s0 + $0x18] sm:$0xff]  ;;  %v30_v20 = vld [vmem:[%s1999_s0 + $0x20] sm:$0xff]  ;;  %v1387_v22 = vpack.c.bf16 %v427_v17, %v426_v16  ;;  %v429_v24 = vld [vmem:[%s2000_s3 + $0x28] sm:$0xff] }
   0x7   :  { %1191 = vmatprep.mubr.msk.f32.mxu1 %vm70_vm0, %v42_v8  ;;  %v45_v19 = vld [vmem:[%s1999_s0 + $0x98] sm:$0xff]  ;;  %v46_v21 = vld [vmem:[%s1999_s0 + $0xa0] sm:$0xff]  ;;  %v31_v25 = vld [vmem:[%s1999_s0 + $0x28] sm:$0xff] }
   0x8   :  { %v428_v23 = vld [vmem:[%s2000_s3 + $0x20] sm:$0xff]  ;;  %v47_v26 = vld [vmem:[%s1999_s0 + $0xa8] sm:$0xff]  ;;  %v32_v27 = vld [vmem:[%s1999_s0 + $0x30] sm:$0xff] }
   0x9   :  { %1382 = vmatpush3.bf16.msra.mxu0 %v1379_v6  ;;  %1451 = vmatpush3.bf16.msra.mxu1 %v1379_v6  ;;  %v48_v28 = vld [vmem:[%s1999_s0 + $0xb0] sm:$0xff]  ;;  %v1391_v29 = vpack.c.bf16 %v429_v24, %v428_v23  ;;  %v431_v31 = vld [vmem:[%s2000_s3 + $0x38] sm:$0xff]  ;;  %v34_v34 = vld [vmem:[%s1999_s0 + $0x40] sm:$0xff] }
   0xa   :  { %1165 = vmatprep.subr.mxu0 %v62_v7  ;;  %1449 = vmatprep.subr.mxu1 %v62_v7  ;;  %v430_v30 = vld [vmem:[%s2000_s3 + $0x30] sm:$0xff]  ;;  %v33_v32 = vld [vmem:[%s1999_s0 + $0x38] sm:$0xff]  ;;  %v50_v35 = vld [vmem:[%s1999_s0 + $0xc0] sm:$0xff] }
   0xb   :  { %v49_v33 = vld [vmem:[%s1999_s0 + $0xb8] sm:$0xff]  ;;  %v1395_v36 = vpack.c.bf16 %v431_v31, %v430_v30  ;;  %v432_v37 = vld [vmem:[%s2000_s3 + $0x40] sm:$0xff]  ;;  %v433_v38 = vld [vmem:[%s2000_s3 + $0x48] sm:$0xff] }
   0xc   :  { %v35_v39 = vld [vmem:[%s1999_s0 + $0x48] sm:$0xff]  ;;  %v36_v41 = vld [vmem:[%s1999_s0 + $0x50] sm:$0xff]  ;;  %v1399_v43 = vpack.c.bf16 %v433_v38, %v432_v37  ;;  %v435_v45 = vld [vmem:[%s2000_s3 + $0x58] sm:$0xff] }
   0xd   :  { %1166 = vmatpush3.msra.mxu0 %v62_v7  ;;  %1452 = vmatpush3.msra.mxu1 %v62_v7  ;;  %v51_v40 = vld [vmem:[%s1999_s0 + $0xc8] sm:$0xff]  ;;  %v52_v42 = vld [vmem:[%s1999_s0 + $0xd0] sm:$0xff]  ;;  %v37_v46 = vld [vmem:[%s1999_s0 + $0x58] sm:$0xff] }
   0xe   :  { %1168 = vmatmul.mubr.msk.f32.vlgmr.msra.gmra.mrb[0].mxu0 %vm70_vm0, %v27_v9  ;;  %1192 = vmatmul.mubr.msk.f32.vlgmr.msra.gmra.mrb[0].mxu1 %vm70_vm0, %v43_v10  ;;  %v434_v44 = vld [vmem:[%s2000_s3 + $0x50] sm:$0xff]  ;;  %v53_v47 = vld [vmem:[%s1999_s0 + $0xd8] sm:$0xff]  ;;  %v38_v48 = vld [vmem:[%s1999_s0 + $0x60] sm:$0xff] }
   0xf   :  { %1170 = vmatprep.mubr.msk.f32.mxu0 %vm70_vm0, %v28_v11  ;;  %1194 = vmatprep.mubr.msk.f32.mxu1 %vm70_vm0, %v44_v12  ;;  %v54_v49 = vld [vmem:[%s1999_s0 + $0xe0] sm:$0xff]  ;;  %v1403_v50 = vpack.c.bf16 %v435_v45, %v434_v44  ;;  %v437_v52 = vld [vmem:[%s2000_s3 + $0x68] sm:$0xff]  ;;  %v40_v55 = vld [vmem:[%s1999_s0 + $0x70] sm:$0xff] }
  0x10   :  { %1384 = vmatprep.subr.bf16.mxu1 %v1383_v15  ;;  %v436_v51 = vld [vmem:[%s2000_s3 + $0x60] sm:$0xff]  ;;  %v39_v53 = vld [vmem:[%s1999_s0 + $0x68] sm:$0xff]  ;;  %v56_v56 = vld [vmem:[%s1999_s0 + $0xf0] sm:$0xff] }
  0x11   :  { %1386 = vmatpush3.bf16.msra.mxu1 %v1383_v15  ;;  %v55_v54 = vld [vmem:[%s1999_s0 + $0xe8] sm:$0xff]  ;;  %v1407_v57 = vpack.c.bf16 %v437_v52, %v436_v51  ;;  %v41_v58 = vld [vmem:[%s1999_s0 + $0x78] sm:$0xff]  ;;  %v438_v60 = vld [vmem:[%s2000_s3 + $0x70] sm:$0xff] }
  0x12   :  { %1171 = vmatmul.mubr.msk.f32.gmra.mrb[2].mxu0 %vm70_vm0, %v29_v18  ;;  %1195 = vmatmul.mubr.msk.f32.gmra.mrb[2].mxu1 %vm70_vm0, %v45_v19  ;;  %v57_v59 = vld [vmem:[%s1999_s0 + $0xf8] sm:$0xff]  ;;  %v704_v63 = vld [vmem:[%s2001_s5] sm:$0xff]  ;;  %v705_v0 = vld [vmem:[%s2001_s5 + $0x8] sm:$0xff] }
  0x13   :  { %1173 = vmatprep.mubr.msk.f32.mxu0 %vm70_vm0, %v30_v20  ;;  %1197 = vmatprep.mubr.msk.f32.mxu1 %vm70_vm0, %v46_v21  ;;  %v439_v61 = vld [vmem:[%s2000_s3 + $0x78] sm:$0xff]  ;;  %v706_v1 = vld [vmem:[%s2001_s5 + $0x10] sm:$0xff]  ;;  %v1415_v2 = vpack.c.bf16 %v705_v0, %v704_v63  ;;  %v708_v5 = vld [vmem:[%s2001_s5 + $0x20] sm:$0xff] }
  0x14   :  { %1388 = vmatprep.subr.bf16.mxu1 %v1387_v22  ;;  %v1411_v62 = vpack.c.bf16 %v439_v61, %v438_v60  ;;  %v707_v3 = vld [vmem:[%s2001_s5 + $0x18] sm:$0xff]  ;;  %v709_v6 = vld [vmem:[%s2001_s5 + $0x28] sm:$0xff]  ;;  %v710_v8 = vld [vmem:[%s2001_s5 + $0x30] sm:$0xff] }
  0x15   :  { %1390 = vmatpush3.bf16.msra.mxu1 %v1387_v22  ;;  %v1419_v4 = vpack.c.bf16 %v707_v3, %v706_v1  ;;  %1416 = vmatprep.subr.bf16.mxu0 %v1415_v2  ;;  %v1423_v7 = vpack.c.bf16 %v709_v6, %v708_v5  ;;  %v711_v9 = vld [vmem:[%s2001_s5 + $0x38] sm:$0xff]  ;;  %v712_v11 = vld [vmem:[%s2001_s5 + $0x40] sm:$0xff]  ;;  %v713_v12 = vld [vmem:[%s2001_s5 + $0x48] sm:$0xff] }
  0x16   :  { %1174 = vmatmul.mubr.msk.f32.gmra.mrb[4].mxu0 %vm70_vm0, %v31_v25  ;;  %1198 = vmatmul.mubr.msk.f32.gmra.mrb[4].mxu1 %vm70_vm0, %v47_v26  ;;  %v1427_v10 = vpack.c.bf16 %v711_v9, %v710_v8  ;;  %v1431_v13 = vpack.c.bf16 %v713_v12, %v712_v11  ;;  %v714_v14 = vld [vmem:[%s2001_s5 + $0x50] sm:$0xff]  ;;  %v715_v15 = vld [vmem:[%s2001_s5 + $0x58] sm:$0xff]  ;;  %v716_v17 = vld [vmem:[%s2001_s5 + $0x60] sm:$0xff] }
  0x17   :  { %1176 = vmatprep.mubr.msk.f32.mxu0 %vm70_vm0, %v32_v27  ;;  %1200 = vmatprep.mubr.msk.f32.mxu1 %vm70_vm0, %v48_v28  ;;  %v1435_v16 = vpack.c.bf16 %v715_v15, %v714_v14  ;;  %v717_v18 = vld [vmem:[%s2001_s5 + $0x68] sm:$0xff]  ;;  %v1729_v20 = vld [vmem:[%s2002_s2] ss:$0 sm:$0xff] }
  0x18   :  { %1392 = vmatprep.subr.bf16.mxu1 %v1391_v29  ;;  %1418 = vmatpush3.bf16.msra.mxu0 %v1415_v2  ;;  %v1439_v19 = vpack.c.bf16 %v717_v18, %v716_v17 }
  0x19   :  { %1394 = vmatpush3.bf16.msra.mxu1 %v1391_v29  ;;  %1420 = vmatprep.subr.bf16.mxu0 %v1419_v4 }
  0x1a   :  { %1177 = vmatmul.mubr.msk.f32.gmra.mrb[6].mxu0 %vm70_vm0, %v33_v32  ;;  %1201 = vmatmul.mubr.msk.f32.gmra.mrb[6].mxu1 %vm70_vm0, %v49_v33 }
  0x1b   :  { %1179 = vmatprep.mubr.msk.f32.mxu0 %vm70_vm0, %v34_v34  ;;  %1203 = vmatprep.mubr.msk.f32.mxu1 %vm70_vm0, %v50_v35 }
  0x1c   :  { %1396 = vmatprep.subr.bf16.mxu1 %v1395_v36  ;;  %1422 = vmatpush3.bf16.msra.mxu0 %v1419_v4 }
  0x1d   :  { %1398 = vmatpush3.bf16.msra.mxu1 %v1395_v36  ;;  %1424 = vmatprep.subr.bf16.mxu0 %v1423_v7 }
  0x1e   :  { %1180 = vmatmul.mubr.msk.f32.gmra.mrb[8].mxu0 %vm70_vm0, %v35_v39  ;;  %1204 = vmatmul.mubr.msk.f32.gmra.mrb[8].mxu1 %vm70_vm0, %v51_v40 }
  0x1f   :  { %1182 = vmatprep.mubr.msk.f32.mxu0 %vm70_vm0, %v36_v41  ;;  %1206 = vmatprep.mubr.msk.f32.mxu1 %vm70_vm0, %v52_v42 }
  0x20   :  { %1400 = vmatprep.subr.bf16.mxu1 %v1399_v43  ;;  %1426 = vmatpush3.bf16.msra.mxu0 %v1423_v7 }
  0x21   :  { %1402 = vmatpush3.bf16.msra.mxu1 %v1399_v43  ;;  %1428 = vmatprep.subr.bf16.mxu0 %v1427_v10 }
  0x22   :  { %1183 = vmatmul.mubr.msk.f32.gmra.mrb[10].mxu0 %vm70_vm0, %v37_v46  ;;  %1207 = vmatmul.mubr.msk.f32.gmra.mrb[10].mxu1 %vm70_vm0, %v53_v47 }
  0x23   :  { %1185 = vmatprep.mubr.msk.f32.mxu0 %vm70_vm0, %v38_v48  ;;  %1209 = vmatprep.mubr.msk.f32.mxu1 %vm70_vm0, %v54_v49 }
  0x24   :  { %1404 = vmatprep.subr.bf16.mxu1 %v1403_v50  ;;  %1430 = vmatpush3.bf16.msra.mxu0 %v1427_v10 }
  0x25   :  { %1406 = vmatpush3.bf16.msra.mxu1 %v1403_v50  ;;  %1432 = vmatprep.subr.bf16.mxu0 %v1431_v13 }
  0x26   :  { %1186 = vmatmul.mubr.msk.f32.gmra.mrb[12].mxu0 %vm70_vm0, %v39_v53  ;;  %1210 = vmatmul.mubr.msk.f32.gmra.mrb[12].mxu1 %vm70_vm0, %v55_v54 }
  0x27   :  { %1188 = vmatprep.mubr.msk.f32.mxu0 %vm70_vm0, %v40_v55  ;;  %1212 = vmatprep.mubr.msk.f32.mxu1 %vm70_vm0, %v56_v56 }
  0x28   :  { %1408 = vmatprep.subr.bf16.mxu1 %v1407_v57  ;;  %1434 = vmatpush3.bf16.msra.mxu0 %v1431_v13 }
  0x29   :  { %1410 = vmatpush3.bf16.msra.mxu1 %v1407_v57  ;;  %1436 = vmatprep.subr.bf16.mxu0 %v1435_v16 }
  0x2a   :  { %1189 = vmatmul.mubr.msk.f32.gmra.mrb[14].mxu0 %vm70_vm0, %v41_v58  ;;  %1213 = vmatmul.mubr.msk.f32.gmra.mrb[14].mxu1 %vm70_vm0, %v57_v59 }
  0x2b   :  { %1412 = vmatprep.subr.bf16.mxu1 %v1411_v62 }
  0x2c   :  { %1438 = vmatpush3.bf16.msra.mxu0 %v1435_v16 }
  0x2d   :  { %1414 = vmatpush3.bf16.msra.mxu1 %v1411_v62  ;;  %1440 = vmatprep.subr.bf16.mxu0 %v1439_v19 }
  0x30   :  { %1442 = vmatpush3.bf16.msra.mxu0 %v1439_v19 }
  0xe1   :  { %v1169_v21 = vpop.f32.mrb[0].mxu0  ;;  %v1731_v22 = vpop.f32.mrb[0].mxu1 }
  0xe2   :  { %v239_v23 = vadd.f32 %v1169_v21, %v1729_v20  ;;  %v233_v24 = vpop.f32.mrb[1].mxu0  ;;  %v1734_v25 = vpop.f32.mrb[1].mxu1 }
  0xe3   :  { %v234_v26 = vadd.f32 %v1729_v20, %v233_v24  ;;  %v314_v13 = vadd.f32 %v1729_v20, %v1734_v25 }
  0xe4   :  { %v393_v30 = vmax.f32 %v239_v23, 0.0 }
  0xe5   :  { %v392_v27 = vmax.f32 %v234_v26, 0.0  ;;  %v1172_v28 = vpop.f32.mrb[2].mxu0  ;;  %v1737_v29 = vpop.f32.mrb[2].mxu1  ;;  %v408_v23 = vmax.f32 %v314_v13, 0.0 }
  0xe6   :  { %v249_v31 = vadd.f32 %v1172_v28, %v1729_v20  ;;  %v243_v32 = vpop.f32.mrb[3].mxu0  ;;  %v1740_v33 = vpop.f32.mrb[3].mxu1 }
  0xe7   :  { %v244_v34 = vadd.f32 %v1729_v20, %v243_v32  ;;  %1247 = vmatprep.mubr.f32.mxu1 %v392_v27  ;;  %v324_v24 = vadd.f32 %v1729_v20, %v1740_v33  ;;  %v319_v27 = vadd.f32 %v1731_v22, %v1729_v20 }
  0xe8   :  { %1248 = vmatmul.mubr.f32.vlgmr.msra.gmra.mrb[16].mxu1 %v393_v30  ;;  %v395_v38 = vmax.f32 %v249_v31, 0.0  ;;  %v329_v31 = vadd.f32 %v1737_v29, %v1729_v20 }
  0xe9   :  { %v394_v35 = vmax.f32 %v244_v34, 0.0  ;;  %v1175_v36 = vpop.f32.mrb[4].mxu0  ;;  %v1743_v37 = vpop.f32.mrb[4].mxu1  ;;  %v410_v25 = vmax.f32 %v324_v24, 0.0  ;;  %v409_v30 = vmax.f32 %v319_v27, 0.0 }
  0xea   :  { %v259_v39 = vadd.f32 %v1175_v36, %v1729_v20  ;;  %v253_v40 = vpop.f32.mrb[5].mxu0  ;;  %v1746_v41 = vpop.f32.mrb[5].mxu1  ;;  %v411_v34 = vmax.f32 %v329_v31, 0.0  ;;  %v339_v22 = vadd.f32 %v1743_v37, %v1729_v20 }
  0xeb   :  { %v254_v42 = vadd.f32 %v1729_v20, %v253_v40  ;;  %1250 = vmatprep.mubr.f32.mxu1 %v394_v35  ;;  %v334_v28 = vadd.f32 %v1729_v20, %v1746_v41 }
  0xec   :  { %1251 = vmatmul.mubr.f32.gmra.mrb[18].mxu1 %v395_v38  ;;  %v397_v46 = vmax.f32 %v259_v39, 0.0  ;;  %v413_v38 = vmax.f32 %v339_v22, 0.0 }
  0xed   :  { %v396_v43 = vmax.f32 %v254_v42, 0.0  ;;  %v1178_v44 = vpop.f32.mrb[6].mxu0  ;;  %v1749_v45 = vpop.f32.mrb[6].mxu1  ;;  %v412_v32 = vmax.f32 %v334_v28, 0.0 }
  0xee   :  { %v269_v47 = vadd.f32 %v1178_v44, %v1729_v20  ;;  %v263_v48 = vpop.f32.mrb[7].mxu0  ;;  %v343_v49 = vpop.f32.mrb[7].mxu1  ;;  %v349_v39 = vadd.f32 %v1749_v45, %v1729_v20 }
  0xef   :  { %v264_v50 = vadd.f32 %v1729_v20, %v263_v48  ;;  %1253 = vmatprep.mubr.f32.mxu1 %v396_v43  ;;  %v344_v33 = vadd.f32 %v1729_v20, %v343_v49 }
  0xf0   :  { %1254 = vmatmul.mubr.f32.gmra.mrb[20].mxu1 %v397_v46  ;;  %v399_v54 = vmax.f32 %v269_v47, 0.0  ;;  %v415_v41 = vmax.f32 %v349_v39, 0.0 }
  0xf1   :  { %v398_v51 = vmax.f32 %v264_v50, 0.0  ;;  %v1181_v52 = vpop.f32.mrb[8].mxu0  ;;  %v1753_v53 = vpop.f32.mrb[8].mxu1  ;;  %v414_v35 = vmax.f32 %v344_v33, 0.0 }
  0xf2   :  { %v279_v55 = vadd.f32 %v1181_v52, %v1729_v20  ;;  %v273_v56 = vpop.f32.mrb[9].mxu0  ;;  %v353_v57 = vpop.f32.mrb[9].mxu1  ;;  %v359_v42 = vadd.f32 %v1753_v53, %v1729_v20 }
  0xf3   :  { %v274_v58 = vadd.f32 %v1729_v20, %v273_v56  ;;  %1256 = vmatprep.mubr.f32.mxu1 %v398_v51  ;;  %v354_v36 = vadd.f32 %v1729_v20, %v353_v57  ;;  %v1799_v57 = vld [vmem:[%s2003_s4] ss:$0 sm:$0xff] }
  0xf4   :  { %1257 = vmatmul.mubr.f32.gmra.mrb[22].mxu1 %v399_v54  ;;  %v401_v62 = vmax.f32 %v279_v55, 0.0  ;;  %v417_v44 = vmax.f32 %v359_v42, 0.0  ;;  %v718_v54 = vld [vmem:[%s2001_s5 + $0x70] sm:$0xff]  ;;  %v719_v55 = vld [vmem:[%s2001_s5 + $0x78] sm:$0xff] }
  0xf5   :  { %v400_v59 = vmax.f32 %v274_v58, 0.0  ;;  %v1184_v60 = vpop.f32.mrb[10].mxu0  ;;  %v1757_v61 = vpop.f32.mrb[10].mxu1  ;;  %v416_v29 = vmax.f32 %v354_v36, 0.0  ;;  %v1443_v56 = vpack.c.bf16 %v719_v55, %v718_v54 }
  0xf6   :  { %v289_v63 = vadd.f32 %v1184_v60, %v1729_v20  ;;  %v283_v0 = vpop.f32.mrb[11].mxu0  ;;  %v363_v1 = vpop.f32.mrb[11].mxu1  ;;  %v369_v46 = vadd.f32 %v1757_v61, %v1729_v20 }
  0xf7   :  { %v284_v2 = vadd.f32 %v1729_v20, %v283_v0  ;;  %1259 = vmatprep.mubr.f32.mxu1 %v400_v59  ;;  %v364_v40 = vadd.f32 %v1729_v20, %v363_v1  ;;  %1444 = vmatprep.subr.bf16.mxu0 %v1443_v56 }
  0xf8   :  { %1260 = vmatmul.mubr.f32.gmra.mrb[24].mxu1 %v401_v62  ;;  %v403_v6 = vmax.f32 %v289_v63, 0.0  ;;  %v419_v48 = vmax.f32 %v369_v46, 0.0  ;;  %1446 = vmatpush3.bf16.msra.mxu0 %v1443_v56 }
  0xf9   :  { %v402_v3 = vmax.f32 %v284_v2, 0.0  ;;  %v1187_v4 = vpop.f32.mrb[12].mxu0  ;;  %v1211_v5 = vpop.f32.mrb[12].mxu1  ;;  %v418_v37 = vmax.f32 %v364_v40, 0.0 }
  0xfa   :  { %v299_v7 = vadd.f32 %v1187_v4, %v1729_v20  ;;  %v293_v8 = vpop.f32.mrb[13].mxu0  ;;  %v373_v9 = vpop.f32.mrb[13].mxu1  ;;  %v379_v49 = vadd.f32 %v1211_v5, %v1729_v20 }
  0xfb   :  { %v294_v10 = vadd.f32 %v1729_v20, %v293_v8  ;;  %1262 = vmatprep.mubr.f32.mxu1 %v402_v3  ;;  %v374_v43 = vadd.f32 %v1729_v20, %v373_v9 }
  0xfc   :  { %1263 = vmatmul.mubr.f32.gmra.mrb[26].mxu1 %v403_v6  ;;  %v405_v15 = vmax.f32 %v299_v7, 0.0  ;;  %v421_v51 = vmax.f32 %v379_v49, 0.0 }
  0xfd   :  { %v404_v11 = vmax.f32 %v294_v10, 0.0  ;;  %v1190_v12 = vpop.f32.mrb[14].mxu0  ;;  %v1214_v14 = vpop.f32.mrb[14].mxu1  ;;  %v420_v45 = vmax.f32 %v374_v43, 0.0 }
  0xfe   :  { %v309_v16 = vadd.f32 %v1190_v12, %v1729_v20  ;;  %v303_v17 = vpop.f32.mrb[15].mxu0  ;;  %v383_v18 = vpop.f32.mrb[15].mxu1  ;;  %v389_v52 = vadd.f32 %v1214_v14, %v1729_v20 }
  0xff   :  { %v304_v19 = vadd.f32 %v1729_v20, %v303_v17  ;;  %1265 = vmatprep.mubr.f32.mxu1 %v404_v11  ;;  %v384_v47 = vadd.f32 %v1729_v20, %v383_v18 }
 0x100   :  { %1266 = vmatmul.mubr.f32.gmra.mrb[28].mxu1 %v405_v15  ;;  %v407_v26 = vmax.f32 %v309_v16, 0.0  ;;  %v423_v53 = vmax.f32 %v389_v52, 0.0 }
 0x101   :  { %v406_v21 = vmax.f32 %v304_v19, 0.0  ;;  %v422_v50 = vmax.f32 %v384_v47, 0.0 }
 0x103   :  { %1268 = vmatprep.mubr.f32.mxu1 %v406_v21 }
 0x104   :  { %1269 = vmatmul.mubr.f32.gmra.mrb[30].mxu1 %v407_v26 }
 0x105   :  { %1271 = vmatprep.mubr.f32.mxu1 %v408_v23 }
 0x108   :  { %1272 = vmatmul.mubr.f32.gmra.mrb[32].mxu1 %v409_v30 }
 0x109   :  { %1274 = vmatprep.mubr.f32.mxu1 %v410_v25 }
 0x10c   :  { %1275 = vmatmul.mubr.f32.gmra.mrb[34].mxu1 %v411_v34 }
 0x10d   :  { %1277 = vmatprep.mubr.f32.mxu1 %v412_v32 }
 0x110   :  { %1278 = vmatmul.mubr.f32.gmra.mrb[36].mxu1 %v413_v38 }
 0x111   :  { %1280 = vmatprep.mubr.f32.mxu1 %v414_v35 }
 0x114   :  { %1281 = vmatmul.mubr.f32.gmra.mrb[38].mxu1 %v415_v41 }
 0x115   :  { %1283 = vmatprep.mubr.f32.mxu1 %v416_v29 }
 0x118   :  { %1284 = vmatmul.mubr.f32.gmra.mrb[40].mxu1 %v417_v44 }
 0x119   :  { %1286 = vmatprep.mubr.f32.mxu1 %v418_v37 }
 0x11c   :  { %1287 = vmatmul.mubr.f32.gmra.mrb[42].mxu1 %v419_v48 }
 0x11d   :  { %1289 = vmatprep.mubr.f32.mxu1 %v420_v45 }
 0x120   :  { %1290 = vmatmul.mubr.f32.gmra.mrb[44].mxu1 %v421_v51 }
 0x121   :  { %1292 = vmatprep.mubr.f32.mxu1 %v422_v50 }
 0x124   :  { %1293 = vmatmul.mubr.f32.gmra.mrb[46].mxu1 %v423_v53 }
 0x1bb   :  { %v1249_v20 = vpop.f32.mrb[16].mxu1 }
 0x1bc   :  { %v519_v58 = vadd.f32 %v1249_v20, %v1799_v57  ;;  %v513_v59 = vpop.f32.mrb[17].mxu1 }
 0x1bd   :  { %v514_v60 = vadd.f32 %v1799_v57, %v513_v59 }
 0x1be   :  { %v673_v63 = vmax.f32 %v519_v58, 0.0 }
 0x1bf   :  { %v672_v61 = vmax.f32 %v514_v60, 0.0  ;;  %v1252_v62 = vpop.f32.mrb[18].mxu1 }
 0x1c0   :  { %v529_v0 = vadd.f32 %v1252_v62, %v1799_v57  ;;  %v523_v1 = vpop.f32.mrb[19].mxu1 }
 0x1c1   :  { %v524_v2 = vadd.f32 %v1799_v57, %v523_v1  ;;  %1327 = vmatprep.mubr.f32.mxu0 %v672_v61 }
 0x1c2   :  { %1328 = vmatmul.mubr.f32.vlgmr.msra.gmra.mrb[16].mxu0 %v673_v63  ;;  %v675_v5 = vmax.f32 %v529_v0, 0.0 }
 0x1c3   :  { %v674_v3 = vmax.f32 %v524_v2, 0.0  ;;  %v1255_v4 = vpop.f32.mrb[20].mxu1 }
 0x1c4   :  { %v539_v6 = vadd.f32 %v1255_v4, %v1799_v57  ;;  %v533_v7 = vpop.f32.mrb[21].mxu1 }
 0x1c5   :  { %v534_v8 = vadd.f32 %v1799_v57, %v533_v7  ;;  %1330 = vmatprep.mubr.f32.mxu0 %v674_v3 }
 0x1c6   :  { %1331 = vmatmul.mubr.f32.gmra.mrb[18].mxu0 %v675_v5  ;;  %v677_v11 = vmax.f32 %v539_v6, 0.0 }
 0x1c7   :  { %v676_v9 = vmax.f32 %v534_v8, 0.0  ;;  %v1258_v10 = vpop.f32.mrb[22].mxu1 }
 0x1c8   :  { %v549_v12 = vadd.f32 %v1258_v10, %v1799_v57  ;;  %v543_v13 = vpop.f32.mrb[23].mxu1 }
 0x1c9   :  { %v544_v14 = vadd.f32 %v1799_v57, %v543_v13  ;;  %1333 = vmatprep.mubr.f32.mxu0 %v676_v9 }
 0x1ca   :  { %1334 = vmatmul.mubr.f32.gmra.mrb[20].mxu0 %v677_v11  ;;  %v679_v17 = vmax.f32 %v549_v12, 0.0 }
 0x1cb   :  { %v678_v15 = vmax.f32 %v544_v14, 0.0  ;;  %v1261_v16 = vpop.f32.mrb[24].mxu1 }
 0x1cc   :  { %v559_v18 = vadd.f32 %v1261_v16, %v1799_v57  ;;  %v553_v19 = vpop.f32.mrb[25].mxu1 }
 0x1cd   :  { %v554_v21 = vadd.f32 %v1799_v57, %v553_v19  ;;  %1336 = vmatprep.mubr.f32.mxu0 %v678_v15 }
 0x1ce   :  { %1337 = vmatmul.mubr.f32.gmra.mrb[22].mxu0 %v679_v17  ;;  %v681_v26 = vmax.f32 %v559_v18, 0.0 }
 0x1cf   :  { %v680_v23 = vmax.f32 %v554_v21, 0.0  ;;  %v1264_v24 = vpop.f32.mrb[26].mxu1 }
 0x1d0   :  { %v569_v27 = vadd.f32 %v1264_v24, %v1799_v57  ;;  %v563_v25 = vpop.f32.mrb[27].mxu1 }
 0x1d1   :  { %v564_v28 = vadd.f32 %v1799_v57, %v563_v25  ;;  %1339 = vmatprep.mubr.f32.mxu0 %v680_v23 }
 0x1d2   :  { %1340 = vmatmul.mubr.f32.gmra.mrb[24].mxu0 %v681_v26  ;;  %v683_v32 = vmax.f32 %v569_v27, 0.0 }
 0x1d3   :  { %v682_v30 = vmax.f32 %v564_v28, 0.0  ;;  %v1267_v31 = vpop.f32.mrb[28].mxu1  ;;  %v1836_v28 = vld [vmem:[%s2004_s6] ss:$0 sm:$0xff] }
 0x1d4   :  { %v579_v33 = vadd.f32 %v1267_v31, %v1799_v57  ;;  %v573_v34 = vpop.f32.mrb[29].mxu1 }
 0x1d5   :  { %v574_v22 = vadd.f32 %v1799_v57, %v573_v34  ;;  %1342 = vmatprep.mubr.f32.mxu0 %v682_v30 }
 0x1d6   :  { %1343 = vmatmul.mubr.f32.gmra.mrb[26].mxu0 %v683_v32  ;;  %v685_v38 = vmax.f32 %v579_v33, 0.0 }
 0x1d7   :  { %v684_v35 = vmax.f32 %v574_v22, 0.0  ;;  %v1270_v36 = vpop.f32.mrb[30].mxu1 }
 0x1d8   :  { %v589_v39 = vadd.f32 %v1270_v36, %v1799_v57  ;;  %v583_v29 = vpop.f32.mrb[31].mxu1 }
 0x1d9   :  { %v584_v40 = vadd.f32 %v1799_v57, %v583_v29  ;;  %1345 = vmatprep.mubr.f32.mxu0 %v684_v35 }
 0x1da   :  { %1346 = vmatmul.mubr.f32.gmra.mrb[28].mxu0 %v685_v38  ;;  %v687_v37 = vmax.f32 %v589_v39, 0.0 }
 0x1db   :  { %v686_v41 = vmax.f32 %v584_v40, 0.0  ;;  %v1273_v42 = vpop.f32.mrb[32].mxu1 }
 0x1dc   :  { %v599_v43 = vadd.f32 %v1273_v42, %v1799_v57  ;;  %v593_v44 = vpop.f32.mrb[33].mxu1 }
 0x1dd   :  { %v594_v46 = vadd.f32 %v1799_v57, %v593_v44  ;;  %1348 = vmatprep.mubr.f32.mxu0 %v686_v41 }
 0x1de   :  { %1349 = vmatmul.mubr.f32.gmra.mrb[30].mxu0 %v687_v37  ;;  %v689_v48 = vmax.f32 %v599_v43, 0.0 }
 0x1df   :  { %v688_v45 = vmax.f32 %v594_v46, 0.0  ;;  %v1276_v47 = vpop.f32.mrb[34].mxu1 }
 0x1e0   :  { %v609_v49 = vadd.f32 %v1276_v47, %v1799_v57  ;;  %v603_v50 = vpop.f32.mrb[35].mxu1 }
 0x1e1   :  { %v604_v51 = vadd.f32 %v1799_v57, %v603_v50  ;;  %1351 = vmatprep.mubr.f32.mxu0 %v688_v45 }
 0x1e2   :  { %1352 = vmatmul.mubr.f32.gmra.mrb[32].mxu0 %v689_v48  ;;  %v691_v54 = vmax.f32 %v609_v49, 0.0 }
 0x1e3   :  { %v690_v52 = vmax.f32 %v604_v51, 0.0  ;;  %v1279_v53 = vpop.f32.mrb[36].mxu1 }
 0x1e4   :  { %v619_v55 = vadd.f32 %v1279_v53, %v1799_v57  ;;  %v613_v56 = vpop.f32.mrb[37].mxu1 }
 0x1e5   :  { %v614_v20 = vadd.f32 %v1799_v57, %v613_v56  ;;  %1354 = vmatprep.mubr.f32.mxu0 %v690_v52 }
 0x1e6   :  { %1355 = vmatmul.mubr.f32.gmra.mrb[34].mxu0 %v691_v54  ;;  %v693_v60 = vmax.f32 %v619_v55, 0.0 }
 0x1e7   :  { %v692_v58 = vmax.f32 %v614_v20, 0.0  ;;  %v1282_v59 = vpop.f32.mrb[38].mxu1 }
 0x1e8   :  { %v629_v61 = vadd.f32 %v1282_v59, %v1799_v57  ;;  %v623_v62 = vpop.f32.mrb[39].mxu1 }
 0x1e9   :  { %v624_v63 = vadd.f32 %v1799_v57, %v623_v62  ;;  %1357 = vmatprep.mubr.f32.mxu0 %v692_v58 }
 0x1ea   :  { %1358 = vmatmul.mubr.f32.gmra.mrb[36].mxu0 %v693_v60  ;;  %v695_v2 = vmax.f32 %v629_v61, 0.0 }
 0x1eb   :  { %v694_v0 = vmax.f32 %v624_v63, 0.0  ;;  %v1285_v1 = vpop.f32.mrb[40].mxu1 }
 0x1ec   :  { %v639_v3 = vadd.f32 %v1285_v1, %v1799_v57  ;;  %v633_v4 = vpop.f32.mrb[41].mxu1 }
 0x1ed   :  { %v634_v5 = vadd.f32 %v1799_v57, %v633_v4  ;;  %1360 = vmatprep.mubr.f32.mxu0 %v694_v0 }
 0x1ee   :  { %1361 = vmatmul.mubr.f32.gmra.mrb[38].mxu0 %v695_v2  ;;  %v697_v8 = vmax.f32 %v639_v3, 0.0 }
 0x1ef   :  { %v696_v6 = vmax.f32 %v634_v5, 0.0  ;;  %v1288_v7 = vpop.f32.mrb[42].mxu1 }
 0x1f0   :  { %v649_v9 = vadd.f32 %v1288_v7, %v1799_v57  ;;  %v643_v10 = vpop.f32.mrb[43].mxu1 }
 0x1f1   :  { %v644_v11 = vadd.f32 %v1799_v57, %v643_v10  ;;  %1363 = vmatprep.mubr.f32.mxu0 %v696_v6 }
 0x1f2   :  { %1364 = vmatmul.mubr.f32.gmra.mrb[40].mxu0 %v697_v8  ;;  %v699_v14 = vmax.f32 %v649_v9, 0.0 }
 0x1f3   :  { %v698_v12 = vmax.f32 %v644_v11, 0.0  ;;  %v1291_v13 = vpop.f32.mrb[44].mxu1 }
 0x1f4   :  { %v659_v15 = vadd.f32 %v1291_v13, %v1799_v57  ;;  %v653_v16 = vpop.f32.mrb[45].mxu1 }
 0x1f5   :  { %v654_v17 = vadd.f32 %v1799_v57, %v653_v16  ;;  %1366 = vmatprep.mubr.f32.mxu0 %v698_v12 }
 0x1f6   :  { %1367 = vmatmul.mubr.f32.gmra.mrb[42].mxu0 %v699_v14  ;;  %v701_v21 = vmax.f32 %v659_v15, 0.0 }
 0x1f7   :  { %v700_v18 = vmax.f32 %v654_v17, 0.0  ;;  %v1294_v19 = vpop.f32.mrb[46].mxu1 }
 0x1f8   :  { %v669_v23 = vadd.f32 %v1294_v19, %v1799_v57  ;;  %v663_v24 = vpop.f32.mrb[47].mxu1 }
 0x1f9   :  { %v664_v26 = vadd.f32 %v1799_v57, %v663_v24  ;;  %1369 = vmatprep.mubr.f32.mxu0 %v700_v18 }
 0x1fa   :  { %1370 = vmatmul.mubr.f32.gmra.mrb[44].mxu0 %v701_v21  ;;  %v703_v25 = vmax.f32 %v669_v23, 0.0 }
 0x1fb   :  { %v702_v27 = vmax.f32 %v664_v26, 0.0 }
 0x1fd   :  { %1372 = vmatprep.mubr.f32.mxu0 %v702_v27 }
 0x1fe   :  { %1373 = vmatmul.mubr.f32.gmra.mrb[46].mxu0 %v703_v25 }
 0x295   :  { %v1329_v30 = vpop.f32.mrb[16].mxu0 }
 0x296   :  { %v799_v31 = vadd.f32 %v1329_v30, %v1836_v28  ;;  %v793_v32 = vpop.f32.mrb[17].mxu0 }
 0x297   :  { %v794_v33 = vadd.f32 %v1836_v28, %v793_v32 }
 0x298   :  { %954 = vst.msk [vmem:[%s2005_s7 + $0x8] sm:$0xff] %vm952_vm1, %v799_v31 }
 0x299   :  { %953 = vst.msk [vmem:[%s2005_s7] sm:$0xff] %vm952_vm1, %v794_v33  ;;  %v1332_v57 = vpop.f32.mrb[18].mxu0 }
 0x29a   :  { %v809_v34 = vadd.f32 %v1332_v57, %v1836_v28  ;;  %v803_v22 = vpop.f32.mrb[19].mxu0 }
 0x29b   :  { %v804_v35 = vadd.f32 %v1836_v28, %v803_v22 }
 0x29c   :  { %956 = vst.msk [vmem:[%s2005_s7 + $0x18] sm:$0xff] %vm952_vm1, %v809_v34 }
 0x29d   :  { %955 = vst.msk [vmem:[%s2005_s7 + $0x10] sm:$0xff] %vm952_vm1, %v804_v35  ;;  %v1335_v36 = vpop.f32.mrb[20].mxu0 }
 0x29e   :  { %v819_v38 = vadd.f32 %v1335_v36, %v1836_v28  ;;  %v813_v39 = vpop.f32.mrb[21].mxu0 }
 0x29f   :  { %v814_v29 = vadd.f32 %v1836_v28, %v813_v39 }
 0x2a0   :  { %958 = vst.msk [vmem:[%s2005_s7 + $0x28] sm:$0xff] %vm952_vm1, %v819_v38 }
 0x2a1   :  { %957 = vst.msk [vmem:[%s2005_s7 + $0x20] sm:$0xff] %vm952_vm1, %v814_v29  ;;  %v1338_v40 = vpop.f32.mrb[22].mxu0 }
 0x2a2   :  { %v829_v41 = vadd.f32 %v1338_v40, %v1836_v28  ;;  %v823_v42 = vpop.f32.mrb[23].mxu0 }
 0x2a3   :  { %v824_v37 = vadd.f32 %v1836_v28, %v823_v42 }
 0x2a4   :  { %960 = vst.msk [vmem:[%s2005_s7 + $0x38] sm:$0xff] %vm952_vm1, %v829_v41 }
 0x2a5   :  { %959 = vst.msk [vmem:[%s2005_s7 + $0x30] sm:$0xff] %vm952_vm1, %v824_v37  ;;  %v1341_v43 = vpop.f32.mrb[24].mxu0 }
 0x2a6   :  { %v839_v44 = vadd.f32 %v1341_v43, %v1836_v28  ;;  %v833_v46 = vpop.f32.mrb[25].mxu0 }
 0x2a7   :  { %v834_v45 = vadd.f32 %v1836_v28, %v833_v46 }
 0x2a8   :  { %962 = vst.msk [vmem:[%s2005_s7 + $0x48] sm:$0xff] %vm952_vm1, %v839_v44 }
 0x2a9   :  { %961 = vst.msk [vmem:[%s2005_s7 + $0x40] sm:$0xff] %vm952_vm1, %v834_v45  ;;  %v1344_v47 = vpop.f32.mrb[26].mxu0 }
 0x2aa   :  { %v849_v48 = vadd.f32 %v1344_v47, %v1836_v28  ;;  %v843_v49 = vpop.f32.mrb[27].mxu0 }
 0x2ab   :  { %v844_v50 = vadd.f32 %v1836_v28, %v843_v49 }
 0x2ac   :  { %964 = vst.msk [vmem:[%s2005_s7 + $0x58] sm:$0xff] %vm952_vm1, %v849_v48 }
 0x2ad   :  { %963 = vst.msk [vmem:[%s2005_s7 + $0x50] sm:$0xff] %vm952_vm1, %v844_v50  ;;  %v1347_v51 = vpop.f32.mrb[28].mxu0 }
 0x2ae   :  { %v859_v52 = vadd.f32 %v1347_v51, %v1836_v28  ;;  %v853_v53 = vpop.f32.mrb[29].mxu0 }
 0x2af   :  { %v854_v54 = vadd.f32 %v1836_v28, %v853_v53 }
 0x2b0   :  { %966 = vst.msk [vmem:[%s2005_s7 + $0x68] sm:$0xff] %vm952_vm1, %v859_v52 }
 0x2b1   :  { %965 = vst.msk [vmem:[%s2005_s7 + $0x60] sm:$0xff] %vm952_vm1, %v854_v54  ;;  %v1350_v55 = vpop.f32.mrb[30].mxu0 }
 0x2b2   :  { %v869_v56 = vadd.f32 %v1350_v55, %v1836_v28  ;;  %v863_v20 = vpop.f32.mrb[31].mxu0 }
 0x2b3   :  { %v864_v58 = vadd.f32 %v1836_v28, %v863_v20 }
 0x2b4   :  { %968 = vst.msk [vmem:[%s2005_s7 + $0x78] sm:$0xff] %vm952_vm1, %v869_v56 }
 0x2b5   :  { %967 = vst.msk [vmem:[%s2005_s7 + $0x70] sm:$0xff] %vm952_vm1, %v864_v58  ;;  %v1353_v59 = vpop.f32.mrb[32].mxu0 }
 0x2b6   :  { %v879_v60 = vadd.f32 %v1353_v59, %v1836_v28  ;;  %v873_v61 = vpop.f32.mrb[33].mxu0 }
 0x2b7   :  { %v874_v62 = vadd.f32 %v1836_v28, %v873_v61 }
 0x2b8   :  { %970 = vst.msk [vmem:[%s2005_s7 + $0x88] sm:$0xff] %vm952_vm1, %v879_v60 }
 0x2b9   :  { %969 = vst.msk [vmem:[%s2005_s7 + $0x80] sm:$0xff] %vm952_vm1, %v874_v62  ;;  %v1356_v63 = vpop.f32.mrb[34].mxu0 }
 0x2ba   :  { %v889_v0 = vadd.f32 %v1356_v63, %v1836_v28  ;;  %v883_v1 = vpop.f32.mrb[35].mxu0 }
 0x2bb   :  { %v884_v2 = vadd.f32 %v1836_v28, %v883_v1 }
 0x2bc   :  { %972 = vst.msk [vmem:[%s2005_s7 + $0x98] sm:$0xff] %vm952_vm1, %v889_v0 }
 0x2bd   :  { %971 = vst.msk [vmem:[%s2005_s7 + $0x90] sm:$0xff] %vm952_vm1, %v884_v2  ;;  %v1359_v3 = vpop.f32.mrb[36].mxu0 }
 0x2be   :  { %v899_v4 = vadd.f32 %v1359_v3, %v1836_v28  ;;  %v893_v5 = vpop.f32.mrb[37].mxu0 }
 0x2bf   :  { %v894_v6 = vadd.f32 %v1836_v28, %v893_v5 }
 0x2c0   :  { %974 = vst.msk [vmem:[%s2005_s7 + $0xa8] sm:$0xff] %vm952_vm1, %v899_v4 }
 0x2c1   :  { %973 = vst.msk [vmem:[%s2005_s7 + $0xa0] sm:$0xff] %vm952_vm1, %v894_v6  ;;  %v1362_v7 = vpop.f32.mrb[38].mxu0 }
 0x2c2   :  { %v909_v8 = vadd.f32 %v1362_v7, %v1836_v28  ;;  %v903_v9 = vpop.f32.mrb[39].mxu0 }
 0x2c3   :  { %v904_v10 = vadd.f32 %v1836_v28, %v903_v9 }
 0x2c4   :  { %976 = vst.msk [vmem:[%s2005_s7 + $0xb8] sm:$0xff] %vm952_vm1, %v909_v8 }
 0x2c5   :  { %975 = vst.msk [vmem:[%s2005_s7 + $0xb0] sm:$0xff] %vm952_vm1, %v904_v10  ;;  %v1365_v11 = vpop.f32.mrb[40].mxu0 }
 0x2c6   :  { %v919_v12 = vadd.f32 %v1365_v11, %v1836_v28  ;;  %v913_v13 = vpop.f32.mrb[41].mxu0 }
 0x2c7   :  { %v914_v14 = vadd.f32 %v1836_v28, %v913_v13 }
 0x2c8   :  { %978 = vst.msk [vmem:[%s2005_s7 + $0xc8] sm:$0xff] %vm952_vm1, %v919_v12 }
 0x2c9   :  { %977 = vst.msk [vmem:[%s2005_s7 + $0xc0] sm:$0xff] %vm952_vm1, %v914_v14  ;;  %v1368_v15 = vpop.f32.mrb[42].mxu0 }
 0x2ca   :  { %v929_v16 = vadd.f32 %v1368_v15, %v1836_v28  ;;  %v923_v17 = vpop.f32.mrb[43].mxu0 }
 0x2cb   :  { %v924_v18 = vadd.f32 %v1836_v28, %v923_v17 }
 0x2cc   :  { %980 = vst.msk [vmem:[%s2005_s7 + $0xd8] sm:$0xff] %vm952_vm1, %v929_v16 }
 0x2cd   :  { %979 = vst.msk [vmem:[%s2005_s7 + $0xd0] sm:$0xff] %vm952_vm1, %v924_v18  ;;  %v1371_v19 = vpop.f32.mrb[44].mxu0 }
 0x2ce   :  { %v939_v21 = vadd.f32 %v1371_v19, %v1836_v28  ;;  %v933_v23 = vpop.f32.mrb[45].mxu0 }
 0x2cf   :  { %v934_v24 = vadd.f32 %v1836_v28, %v933_v23 }
 0x2d0   :  { %982 = vst.msk [vmem:[%s2005_s7 + $0xe8] sm:$0xff] %vm952_vm1, %v939_v21 }
 0x2d1   :  { %981 = vst.msk [vmem:[%s2005_s7 + $0xe0] sm:$0xff] %vm952_vm1, %v934_v24  ;;  %v1374_v26 = vpop.f32.mrb[46].mxu0 }
 0x2d2   :  { %v949_v27 = vadd.f32 %v1374_v26, %v1836_v28  ;;  %v943_v25 = vpop.f32.mrb[47].mxu0 }
 0x2d3   :  { %v944_v30 = vadd.f32 %v1836_v28, %v943_v25 }
 0x2d4   :  { %984 = vst.msk [vmem:[%s2005_s7 + $0xf8] sm:$0xff] %vm952_vm1, %v949_v27 }
 0x2d5   :  { %983 = vst.msk [vmem:[%s2005_s7 + $0xf0] sm:$0xff] %vm952_vm1, %v944_v30 }

</bundles_post_ra>
